<compile_context>
chip_gen: v6e
topology: v6e:2x2x1
jax: 0.10.0
libtpu: 0.0.40
codegen_flags: <defaults>
</compile_context>

<pallas_src>
import jax
import jax.numpy as jnp
from jax.experimental import pallas as pl
from jax.experimental.pallas import tpu as pltpu

H = W = 28
NH = 32           # hidden width
NZ = 10           # output / A_vec width
INP_DIM = H * W + 1   # 785  (last element of x is dropped before sampling)


def _round_up(n, m):
    return ((n + m - 1) // m) * m


# ----------------------------------------------------------------------------
# Pallas kernels
# ----------------------------------------------------------------------------

def _fc_stn_kernel(x_ref, w1_ref, b1_ref, w2_ref, s2_ref, b2_ref, w3_ref, b3_ref,
                   o_ref):
    """Fused localization MLP (one batch tile):
       Linear(785,32) -> LeakyReLU(0.2) -> Linear(32,32) -> BN(folded affine)
       -> LeakyReLU(0.2) -> Linear(32,10).   (Dropouts are identity in eval.)"""
    x = x_ref[...]
    h = jnp.dot(x, w1_ref[...], preferred_element_type=jnp.float32) + b1_ref[...]
    h = jnp.where(h > 0, h, 0.2 * h)
    h = jnp.dot(h, w2_ref[...], preferred_element_type=jnp.float32) * s2_ref[...] + b2_ref[...]
    h = jnp.where(h > 0, h, 0.2 * h)
    o_ref[...] = jnp.dot(h, w3_ref[...], preferred_element_type=jnp.float32) + b3_ref[...]


def fc_stn(x, fc_params, tb=256):
    """x: (B, 785) -> (B, 10); batch-tiled so it pipelines and bounds VMEM."""
    B = x.shape[0]
    tb = min(tb, _round_up(B, 8))
    in_specs = [pl.BlockSpec((tb, INP_DIM), lambda i: (i, 0))]
    # weights/biases are small and block-index-constant -> stay resident in VMEM
    in_specs += [pl.BlockSpec(p.shape, lambda i: (0, 0)) for p in fc_params]
    return pl.pallas_call(
        _fc_stn_kernel,
        grid=(pl.cdiv(B, tb),),
        in_specs=in_specs,
        out_specs=pl.BlockSpec((tb, NZ), lambda i: (i, 0)),
        out_shape=jax.ShapeDtypeStruct((B, NZ), jnp.float32),
        compiler_params=pltpu.CompilerParams(dimension_semantics=("parallel",)),
    )(x, *fc_params)


def _grid_sample_kernel(theta_ref, img_ref, o_ref):
    """affine_grid + bilinear grid_sample (align_corners=False, zeros padding)
       for a tile of TB images.  Output pixels p = i*W + j live on the LANE
       axis, so all intermediates are (TB, 28, 784) and the final store is a
       lane-dense (TB, 784) slab."""
    th = theta_ref[...]                                   # (TB, 6, 1)
    t00 = th[:, 0:1, :]; t01 = th[:, 1:2, :]; t02 = th[:, 2:3, :]
    t10 = th[:, 3:4, :]; t11 = th[:, 4:5, :]; t12 = th[:, 5:6, :]

    # output-pixel base coordinates, built in-kernel (no `base` input DMA)
    p = jax.lax.broadcasted_iota(jnp.float32, (1, 1, H * W), 2)   # p = i*W + j
    i = jnp.floor(p / float(W))
    j = p - float(W) * i
    xb = (2.0 * j + 1.0) / float(W) - 1.0                 # (1, 1, 784)
    yb = (2.0 * i + 1.0) / float(H) - 1.0

    # normalized source coords (F.affine_grid), unnormalized (align_corners=False)
    sx = t00 * xb + t01 * yb + t02                        # (TB, 1, 784)
    sy = t10 * xb + t11 * yb + t12
    ix = ((sx + 1.0) * W - 1.0) * 0.5
    iy = ((sy + 1.0) * H - 1.0) * 0.5

    # bilinear tent weights; out-of-bounds neighbours get zero weight (zeros pad)
    wcols = jax.lax.broadcasted_iota(jnp.float32, (1, W, H * W), 1)
    hrows = jax.lax.broadcasted_iota(jnp.float32, (1, H, H * W), 1)
    wx = jnp.maximum(0.0, 1.0 - jnp.abs(ix - wcols))      # (TB, W, 784)
    wy = jnp.maximum(0.0, 1.0 - jnp.abs(iy - hrows))      # (TB, H, 784)

    img = img_ref[...]                                    # (TB, H, W)
    # t[b, h, p] = sum_w img[b, h, w] * wx[b, w, p]   (batched matmul, no transpose)
    t = jnp.einsum('bhw,bwp->bhp', img, wx, preferred_element_type=jnp.float32)
    # out[b, p] = sum_h wy[b, h, p] * t[b, h, p]
    o_ref[...] = jnp.sum(wy * t, axis=1)                  # (TB, 784) lane-dense


def grid_sample(img, theta6, tb=8):
    """img: (B, 28, 28), theta6: (B, 6, 1) -> (B, 784) flattened samples."""
    B = img.shape[0]
    return pl.pallas_call(
        _grid_sample_kernel,
        grid=(pl.cdiv(B, tb),),
        in_specs=[
            pl.BlockSpec((tb, 6, 1), lambda b: (b, 0, 0)),
            pl.BlockSpec((tb, H, W), lambda b: (b, 0, 0)),
        ],
        out_specs=pl.BlockSpec((tb, H * W), lambda b: (b, 0)),
        out_shape=jax.ShapeDtypeStruct((B, H * W), jnp.float32),
        compiler_params=pltpu.CompilerParams(dimension_semantics=("parallel",)),
    )(theta6, img)


def _matmul_affine_relu_kernel(x_ref, w_ref, s_ref, b_ref, o_ref):
    """Conv layer hot path (after im2col): Y = relu((X @ W) * scale + bias)."""
    y = jnp.dot(x_ref[...], w_ref[...], preferred_element_type=jnp.float32)
    o_ref[...] = jnp.maximum(y * s_ref[...] + b_ref[...], 0.0)


def matmul_affine_relu(x, w, s, b, tm=1024):
    """Row(M)-tiled, pipelined matmul+BN+ReLU.  Per-step VMEM stays ~<3 MB even
       for K=512, so the default scoped-VMEM limit is fine on v5e/v6e/v7x."""
    M, K = x.shape
    N = w.shape[1]
    tm = min(tm, _round_up(M, 8))
    return pl.pallas_call(
        _matmul_affine_relu_kernel,
        grid=(pl.cdiv(M, tm),),
        in_specs=[pl.BlockSpec((tm, K), lambda i: (i, 0)),
                  pl.BlockSpec((K, N), lambda i: (0, 0)),
                  pl.BlockSpec((1, N), lambda i: (0, 0)),
                  pl.BlockSpec((1, N), lambda i: (0, 0))],
        out_specs=pl.BlockSpec((tm, N), lambda i: (i, 0)),
        out_shape=jax.ShapeDtypeStruct((M, N), jnp.float32),
        compiler_params=pltpu.CompilerParams(dimension_semantics=("parallel",)),
    )(x, w, s, b)


# ----------------------------------------------------------------------------
# Plain-JAX glue
# ----------------------------------------------------------------------------

TRIU_I = jnp.array([0, 0, 0, 0, 1, 1, 1, 2, 2, 3], dtype=jnp.int32)
TRIU_J = jnp.array([0, 1, 2, 3, 1, 2, 3, 2, 3, 3], dtype=jnp.int32)


def convert_Avec_to_A(a_vec):
    """(B, 10) -> (B, 4, 4) symmetric (same triu ordering as torch.triu_indices)."""
    B = a_vec.shape[0]
    A = jnp.zeros((B, 4, 4), dtype=a_vec.dtype)
    A = A.at[:, TRIU_I, TRIU_J].set(a_vec)
    A = A.at[:, TRIU_J, TRIU_I].set(a_vec)
    return A


def im2col(x, kh, kw, stride, pad):
    """x: (B, H, W, C) -> ((B*Ho*Wo, kh*kw*C), Ho, Wo). Pure data movement (glue).
    TODO(synk): fusing im2col + the whole 4-layer conv stack into one Pallas
    kernel (keeping per-image intermediates in VMEM) would remove this HBM
    roundtrip entirely; kept in XLA here since in-kernel strided patch
    extraction has no clean, portable Mosaic lowering."""
    B, Hin, Win, C = x.shape
    xp = jnp.pad(x, ((0, 0), (pad, pad), (pad, pad), (0, 0)))
    Ho = (Hin + 2 * pad - kh) // stride + 1
    Wo = (Win + 2 * pad - kw) // stride + 1
    cols = []
    for i in range(kh):
        for j in range(kw):
            cols.append(xp[:, i:i + stride * (Ho - 1) + 1:stride,
                             j:j + stride * (Wo - 1) + 1:stride, :])
    patches = jnp.concatenate(cols, axis=-1)          # (B, Ho, Wo, kh*kw*C)
    return patches.reshape(B * Ho * Wo, kh * kw * C), Ho, Wo


def _linear_init(key, fan_in, fan_out):
    kw_, kb_ = jax.random.split(key)
    bound = 1.0 / (fan_in ** 0.5)
    w = jax.random.uniform(kw_, (fan_in, fan_out), jnp.float32, -bound, bound)
    b = jax.random.uniform(kb_, (1, fan_out), jnp.float32, -bound, bound)
    return w, b


def _conv_init(key, kh, kw, cin, cout):
    kw_, kb_ = jax.random.split(key)
    fan_in = kh * kw * cin
    bound = 1.0 / (fan_in ** 0.5)
    w = jax.random.uniform(kw_, (kh, kw, cin, cout), jnp.float32, -bound, bound)
    b = jax.random.uniform(kb_, (cout,), jnp.float32, -bound, bound)
    # rows ordered (kh, kw, cin) to match im2col concatenation order
    return w.reshape(kh * kw * cin, cout), b


def init_params(key):
    eps = 1e-5
    bn_s = 1.0 / ((1.0 + eps) ** 0.5)   # gamma=1, beta=0, running_mean=0, running_var=1
    ks = jax.random.split(key, 8)

    # fc_stn
    w1, b1 = _linear_init(ks[0], INP_DIM, NH)
    w2, b2 = _linear_init(ks[1], NH, NH)
    w3, b3 = _linear_init(ks[2], NH, NZ)
    s2 = jnp.full((1, NH), bn_s, jnp.float32)    # folded BatchNorm1d scale
    b2f = b2 * bn_s                              # folded BatchNorm1d bias (beta=0, mean=0)
    fc = (w1, b1, w2, s2, b2f, w3, b3)

    # conv stack: (kh, kw, cin, cout, stride, pad, has_bn)
    cfg = [(3, 3, 1, NH, 2, 1, True),
           (3, 3, NH, NH, 2, 1, True),
           (3, 3, NH, NH, 2, 1, True),
           (4, 4, NH, NZ, 1, 0, False)]
    conv = []
    for i, (kh, kw, cin, cout, stride, pad, has_bn) in enumerate(cfg):
        wmat, cb = _conv_init(ks[3 + i], kh, kw, cin, cout)
        if has_bn:
            scale = jnp.full((1, cout), bn_s, jnp.float32)
            bias = (cb * bn_s).reshape(1, cout)
        else:
            scale = jnp.ones((1, cout), jnp.float32)
            bias = cb.reshape(1, cout)
        conv.append((wmat, scale, bias, kh, kw, stride, pad, cout))
    return {"fc": fc, "conv": conv}


def stn_forward(x, params):
    """x: (B, 785) float32  ->  z: (B, 10) float32"""
    B = x.shape[0]

    # --- localization MLP (Pallas, batch-tiled) ---
    a_vec = fc_stn(x, params["fc"])                        # (B, 10)

    # --- symmetric 4x4 eigendecomposition + theta (tiny, plain JAX glue) ---
    # TODO(synk): no Pallas eigensolver; jnp.linalg.eigh stands in for torch.symeig
    # (eigenvector sign is inherently ambiguous, as in the reference).
    A = convert_Avec_to_A(a_vec)
    _, evs = jnp.linalg.eigh(A)                            # ascending eigvals, vecs in columns
    tcos = evs[:, 0, 0]
    tsin = evs[:, 1, 0]
    zero = jnp.zeros_like(tcos)
    # theta rows [t00, t01, t02, t10, t11, t12] = [cos, sin, 0, -sin, cos, 0]
    theta6 = jnp.stack([tcos, tsin, zero, -tsin, tcos, zero], axis=1)[:, :, None]  # (B, 6, 1)

    # --- bilinear grid_sample (Pallas, 8 images per step, lane-dense output) ---
    img = x[:, :H * W].reshape(B, H, W)
    sampled = grid_sample(img, theta6)                     # (B, 784)
    feat = sampled.reshape(B, H, W, 1)                     # NHWC, C=1

    # --- conv stack: im2col (glue) + fused matmul/BN/ReLU (Pallas, M-tiled) ---
    # TODO(synk): Dropout layers are identity (inference mode).
    for (wmat, scale, bias, kh, kw, stride, pad, cout) in params["conv"]:
        p2d, Ho, Wo = im2col(feat, kh, kw, stride, pad)
        y = matmul_affine_relu(p2d, wmat, scale, bias)
        feat = y.reshape(B, Ho, Wo, cout)

    # final map is (B, 1, 1, 10): avg_pool2d over (1,1) + squeeze == reshape
    return feat.reshape(B, NZ)


if __name__ == "__main__":
    key = jax.random.PRNGKey(0)
    kp, kx = jax.random.split(key)
    params = init_params(kp)

    # small batch (single grid step per kernel)
    B = 2
    x = jax.random.normal(kx, (B, INP_DIM), jnp.float32)   # B x 785 (784 pixels + 1 extra)
    z = jax.block_until_ready(stn_forward(x, params))
    assert z.shape == (B, NZ) and z.dtype == jnp.float32
    assert bool(jnp.all(jnp.isfinite(z)))

    # larger batch: exercises multi-step grids and partial (masked) tiles
    B2 = 20
    x2 = jax.random.normal(kx, (B2, INP_DIM), jnp.float32)
    z2 = jax.block_until_ready(stn_forward(x2, params))
    assert z2.shape == (B2, NZ) and z2.dtype == jnp.float32
    assert bool(jnp.all(jnp.isfinite(z2)))

    print("KERNEL_OK")
</pallas_src>

<mosaic_0001>
module attributes {stable_mosaic.version = 11 : i64} {
  func.func @_fc_stn_kernel(%arg0: i32, %arg1: memref<8x785xf32, #tpu.memory_space<vmem>>, %arg2: memref<785x32xf32, #tpu.memory_space<vmem>>, %arg3: memref<1x32xf32, #tpu.memory_space<vmem>>, %arg4: memref<32x32xf32, #tpu.memory_space<vmem>>, %arg5: memref<1x32xf32, #tpu.memory_space<vmem>>, %arg6: memref<1x32xf32, #tpu.memory_space<vmem>>, %arg7: memref<32x10xf32, #tpu.memory_space<vmem>>, %arg8: memref<1x10xf32, #tpu.memory_space<vmem>>, %arg9: memref<8x10xf32, #tpu.memory_space<vmem>>) attributes {dimension_semantics = [#tpu.dimension_semantics<parallel>], iteration_bounds = array<i64: 1>, scalar_prefetch = 0 : i64, scratch_operands = 0 : i64, tpu.core_type = #tpu.core_type<tc>, window_params = [{transform_indices = @transform_0, window_bounds = array<i64: 8, 785>}, {pipeline_mode = #tpu.pipeline_mode<synchronous>, transform_indices = @transform_1, window_bounds = array<i64: 785, 32>}, {pipeline_mode = #tpu.pipeline_mode<synchronous>, transform_indices = @transform_2, window_bounds = array<i64: 1, 32>}, {pipeline_mode = #tpu.pipeline_mode<synchronous>, transform_indices = @transform_3, window_bounds = array<i64: 32, 32>}, {pipeline_mode = #tpu.pipeline_mode<synchronous>, transform_indices = @transform_4, window_bounds = array<i64: 1, 32>}, {pipeline_mode = #tpu.pipeline_mode<synchronous>, transform_indices = @transform_5, window_bounds = array<i64: 1, 32>}, {pipeline_mode = #tpu.pipeline_mode<synchronous>, transform_indices = @transform_6, window_bounds = array<i64: 32, 10>}, {pipeline_mode = #tpu.pipeline_mode<synchronous>, transform_indices = @transform_7, window_bounds = array<i64: 1, 10>}, {transform_indices = @transform_8, window_bounds = array<i64: 8, 10>}]} {
    %c0 = arith.constant 0 : index
    %c0_0 = arith.constant 0 : index
    %0 = vector.load %arg1[%c0, %c0_0] : memref<8x785xf32, #tpu.memory_space<vmem>>, vector<8x785xf32>
    %c0_1 = arith.constant 0 : index
    %c0_2 = arith.constant 0 : index
    %1 = vector.load %arg2[%c0_1, %c0_2] : memref<785x32xf32, #tpu.memory_space<vmem>>, vector<785x32xf32>
    %cst = arith.constant dense<0.000000e+00> : vector<8x32xf32>
    %2 = tpu.matmul %0, %1, %cst {dimension_numbers = #tpu.dot_dimension_numbers<[1], [0], [0], [1], [0, 0, 1, 1], [], []>} : vector<8x785xf32>, vector<785x32xf32>, vector<8x32xf32> -> vector<8x32xf32>
    %c0_3 = arith.constant 0 : index
    %c0_4 = arith.constant 0 : index
    %3 = vector.load %arg3[%c0_3, %c0_4] : memref<1x32xf32, #tpu.memory_space<vmem>>, vector<1x32xf32>
    %4 = vector.broadcast %3 : vector<1x32xf32> to vector<8x32xf32>
    %5 = arith.addf %2, %4 : vector<8x32xf32>
    %cst_5 = arith.constant 0.000000e+00 : f32
    %6 = vector.broadcast %cst_5 : f32 to vector<8x32xf32>
    %7 = arith.cmpf ogt, %5, %6 : vector<8x32xf32>
    %cst_6 = arith.constant 2.000000e-01 : f32
    %8 = vector.broadcast %cst_6 : f32 to vector<8x32xf32>
    %9 = arith.mulf %8, %5 : vector<8x32xf32>
    %10 = arith.select %7, %5, %9 : vector<8x32xi1>, vector<8x32xf32>
    %c0_7 = arith.constant 0 : index
    %c0_8 = arith.constant 0 : index
    %11 = vector.load %arg4[%c0_7, %c0_8] : memref<32x32xf32, #tpu.memory_space<vmem>>, vector<32x32xf32>
    %cst_9 = arith.constant dense<0.000000e+00> : vector<8x32xf32>
    %12 = tpu.matmul %10, %11, %cst_9 {dimension_numbers = #tpu.dot_dimension_numbers<[1], [0], [0], [1], [0, 0, 1, 1], [], []>} : vector<8x32xf32>, vector<32x32xf32>, vector<8x32xf32> -> vector<8x32xf32>
    %c0_10 = arith.constant 0 : index
    %c0_11 = arith.constant 0 : index
    %13 = vector.load %arg5[%c0_10, %c0_11] : memref<1x32xf32, #tpu.memory_space<vmem>>, vector<1x32xf32>
    %14 = vector.broadcast %13 : vector<1x32xf32> to vector<8x32xf32>
    %15 = arith.mulf %12, %14 : vector<8x32xf32>
    %c0_12 = arith.constant 0 : index
    %c0_13 = arith.constant 0 : index
    %16 = vector.load %arg6[%c0_12, %c0_13] : memref<1x32xf32, #tpu.memory_space<vmem>>, vector<1x32xf32>
    %17 = vector.broadcast %16 : vector<1x32xf32> to vector<8x32xf32>
    %18 = arith.addf %15, %17 : vector<8x32xf32>
    %cst_14 = arith.constant 0.000000e+00 : f32
    %19 = vector.broadcast %cst_14 : f32 to vector<8x32xf32>
    %20 = arith.cmpf ogt, %18, %19 : vector<8x32xf32>
    %cst_15 = arith.constant 2.000000e-01 : f32
    %21 = vector.broadcast %cst_15 : f32 to vector<8x32xf32>
    %22 = arith.mulf %21, %18 : vector<8x32xf32>
    %23 = arith.select %20, %18, %22 : vector<8x32xi1>, vector<8x32xf32>
    %c0_16 = arith.constant 0 : index
    %c0_17 = arith.constant 0 : index
    %24 = vector.load %arg7[%c0_16, %c0_17] : memref<32x10xf32, #tpu.memory_space<vmem>>, vector<32x10xf32>
    %cst_18 = arith.constant dense<0.000000e+00> : vector<8x10xf32>
    %25 = tpu.matmul %23, %24, %cst_18 {dimension_numbers = #tpu.dot_dimension_numbers<[1], [0], [0], [1], [0, 0, 1, 1], [], []>} : vector<8x32xf32>, vector<32x10xf32>, vector<8x10xf32> -> vector<8x10xf32>
    %c0_19 = arith.constant 0 : index
    %c0_20 = arith.constant 0 : index
    %26 = vector.load %arg8[%c0_19, %c0_20] : memref<1x10xf32, #tpu.memory_space<vmem>>, vector<1x10xf32>
    %27 = vector.broadcast %26 : vector<1x10xf32> to vector<8x10xf32>
    %28 = arith.addf %25, %27 : vector<8x10xf32>
    %c0_21 = arith.constant 0 : index
    %c0_22 = arith.constant 0 : index
    %29 = vector.load %arg9[%c0_21, %c0_22] : memref<8x10xf32, #tpu.memory_space<vmem>>, vector<8x10xf32>
    tpu.vector_store %arg9[%c0_21, %c0_22], %28 {strides = array<i32>} : memref<8x10xf32, #tpu.memory_space<vmem>>, vector<8x10xf32>,
    return
  }
  func.func @transform_0(%arg0: i32) -> (i32, i32) {
    %c0_i32 = arith.constant 0 : i32
    %c0_i32_0 = arith.constant 0 : i32
    return %arg0, %c0_i32 : i32, i32
  }
  func.func @transform_1(%arg0: i32) -> (i32, i32) {
    %c0_i32 = arith.constant 0 : i32
    %c0_i32_0 = arith.constant 0 : i32
    %c0_i32_1 = arith.constant 0 : i32
    return %c0_i32, %c0_i32_0 : i32, i32
  }
  func.func @transform_2(%arg0: i32) -> (i32, i32) {
    %c0_i32 = arith.constant 0 : i32
    %c0_i32_0 = arith.constant 0 : i32
    %c0_i32_1 = arith.constant 0 : i32
    return %c0_i32, %c0_i32_0 : i32, i32
  }
  func.func @transform_3(%arg0: i32) -> (i32, i32) {
    %c0_i32 = arith.constant 0 : i32
    %c0_i32_0 = arith.constant 0 : i32
    %c0_i32_1 = arith.constant 0 : i32
    return %c0_i32, %c0_i32_0 : i32, i32
  }
  func.func @transform_4(%arg0: i32) -> (i32, i32) {
    %c0_i32 = arith.constant 0 : i32
    %c0_i32_0 = arith.constant 0 : i32
    %c0_i32_1 = arith.constant 0 : i32
    return %c0_i32, %c0_i32_0 : i32, i32
  }
  func.func @transform_5(%arg0: i32) -> (i32, i32) {
    %c0_i32 = arith.constant 0 : i32
    %c0_i32_0 = arith.constant 0 : i32
    %c0_i32_1 = arith.constant 0 : i32
    return %c0_i32, %c0_i32_0 : i32, i32
  }
  func.func @transform_6(%arg0: i32) -> (i32, i32) {
    %c0_i32 = arith.constant 0 : i32
    %c0_i32_0 = arith.constant 0 : i32
    %c0_i32_1 = arith.constant 0 : i32
    return %c0_i32, %c0_i32_0 : i32, i32
  }
  func.func @transform_7(%arg0: i32) -> (i32, i32) {
    %c0_i32 = arith.constant 0 : i32
    %c0_i32_0 = arith.constant 0 : i32
    %c0_i32_1 = arith.constant 0 : i32
    return %c0_i32, %c0_i32_0 : i32, i32
  }
  func.func @transform_8(%arg0: i32) -> (i32, i32) {
    %c0_i32 = arith.constant 0 : i32
    %c0_i32_0 = arith.constant 0 : i32
    return %arg0, %c0_i32 : i32, i32
  }
}

</mosaic_0001>

<bundles_post_ra>
// kernel: tpu_custom_call.1
= control target key start
LH: loop header
LB: loop body
LE: loop exit
PB: predicated region body
PF: predicated region fallthrough
CT: control target
= control target key end

     0   :  { %13 = vsyncpa [#allocation3], 0  ;;  %v916_v29 = vmov 1983009808   ;;  %v159_v31 = vlaneseq  ;;  %vm232_vm0 = vcmask 1040384   ;;  %vm918_vm1 = vmmov 0   ;;  %s1365_s0 = inlined_call_operand.vmem [shape: f32[2,785], index: 0, kind: input, shape index: {}]   ;;  %s1366_s1 = inlined_call_operand.vmem [shape: f32[785,32], index: 1, kind: input, shape index: {}]   ;;  %s1367_s2 = inlined_call_operand.vmem [shape: f32[1,32], index: 2, kind: input, shape index: {}]   ;;  %s1368_s3 = inlined_call_operand.vmem [shape: f32[32,32], index: 3, kind: input, shape index: {}]   ;;  %s1369_s4 = inlined_call_operand.vmem [shape: f32[1,32], index: 4, kind: input, shape index: {}]   ;;  %s1370_s5 = inlined_call_operand.vmem [shape: f32[1,32], index: 5, kind: input, shape index: {}]   ;;  %s1371_s6 = inlined_call_operand.vmem [shape: f32[32,10], index: 6, kind: input, shape index: {}]   ;;  %s1372_s7 = inlined_call_operand.vmem [shape: f32[1,10], index: 7, kind: input, shape index: {}]   ;;  %s1373_s8 = inlined_call_operand.hbm [shape: f32[2,10], index: 8, kind: output, shape index: {}]  }
   0x1   :  { %v69_v0 = vld [vmem:[%s1366_s1 + $0xf8] sm:$0xff]  ;;  %v68_v2 = vld [vmem:[%s1366_s1 + $0xf0] sm:$0xff]  ;;  %v67_v6 = vld [vmem:[%s1366_s1 + $0xe8] sm:$0xff]  ;;  %v157_v30 = vunpack.c.l.s4 %v916_v29  ;;  %vm229_vm2 = vcmask 138240   ;;  %vm523_vm4 = vcmask 261120   ;;  %vm700_vm6 = vcmask 80896  }
   0x2   :  { %v53_v1 = vld [vmem:[%s1366_s1 + $0x78] sm:$0xff]  ;;  %726 = vmatprep.subr.mxu0 %v69_v0  ;;  %v52_v4 = vld [vmem:[%s1366_s1 + $0x70] sm:$0xff]  ;;  %v51_v8 = vld [vmem:[%s1366_s1 + $0x68] sm:$0xff]  ;;  %v160_v41 = vshrl.u32 %v159_v31, 7 }
   0x3   :  { %v101_v3 = vld [vmem:[%s1366_s1 + $0x1f8] sm:$0xff]  ;;  %727 = vmatpush3.msra.mxu0 %v53_v1  ;;  %v100_v7 = vld [vmem:[%s1366_s1 + $0x1f0] sm:$0xff]  ;;  %v66_v10 = vld [vmem:[%s1366_s1 + $0xe0] sm:$0xff]  ;;  %v158_v40 = vunpack.c.0.s8 %v157_v30 }
   0x4   :  { %761 = vmatprep.subr.mxu1 %v101_v3  ;;  %v85_v5 = vld [vmem:[%s1366_s1 + $0x178] sm:$0xff]  ;;  %728 = vmatprep.subr.mxu0 %v68_v2  ;;  %v84_v9 = vld [vmem:[%s1366_s1 + $0x170] sm:$0xff]  ;;  %v99_v11 = vld [vmem:[%s1366_s1 + $0x1e8] sm:$0xff] }
   0x5   :  { %762 = vmatpush3.msra.mxu1 %v85_v5  ;;  %729 = vmatpush3.msra.mxu0 %v52_v4  ;;  %v83_v12 = vld [vmem:[%s1366_s1 + $0x168] sm:$0xff]  ;;  %v50_v13 = vld [vmem:[%s1366_s1 + $0x60] sm:$0xff]  ;;  %v65_v15 = vld [vmem:[%s1366_s1 + $0xd8] sm:$0xff]  ;;  %v1111_v53 = vsub.s32 %v158_v40, %v160_v41 }
   0x6   :  { %763 = vmatprep.subr.mxu1 %v100_v7  ;;  %730 = vmatprep.subr.mxu0 %v67_v6  ;;  %v98_v14 = vld [vmem:[%s1366_s1 + $0x1e0] sm:$0xff]  ;;  %v49_v17 = vld [vmem:[%s1366_s1 + $0x58] sm:$0xff]  ;;  %v64_v19 = vld [vmem:[%s1366_s1 + $0xd0] sm:$0xff] }
   0x7   :  { %764 = vmatpush3.msra.mxu1 %v84_v9  ;;  %731 = vmatpush3.msra.mxu0 %v51_v8  ;;  %v82_v16 = vld [vmem:[%s1366_s1 + $0x160] sm:$0xff]  ;;  %v97_v18 = vld [vmem:[%s1366_s1 + $0x1d8] sm:$0xff]  ;;  %v48_v21 = vld [vmem:[%s1366_s1 + $0x50] sm:$0xff] }
   0x8   :  { %765 = vmatprep.subr.mxu1 %v99_v11  ;;  %732 = vmatprep.subr.mxu0 %v66_v10  ;;  %v81_v20 = vld [vmem:[%s1366_s1 + $0x158] sm:$0xff]  ;;  %v96_v22 = vld [vmem:[%s1366_s1 + $0x1d0] sm:$0xff]  ;;  %v63_v23 = vld [vmem:[%s1366_s1 + $0xc8] sm:$0xff] }
   0x9   :  { %766 = vmatpush3.msra.mxu1 %v83_v12  ;;  %733 = vmatpush3.msra.mxu0 %v50_v13  ;;  %v80_v24 = vld [vmem:[%s1366_s1 + $0x150] sm:$0xff]  ;;  %v47_v25 = vld [vmem:[%s1366_s1 + $0x48] sm:$0xff]  ;;  %v62_v27 = vld [vmem:[%s1366_s1 + $0xc0] sm:$0xff] }
   0xa   :  { %767 = vmatprep.subr.mxu1 %v98_v14  ;;  %734 = vmatprep.subr.mxu0 %v65_v15  ;;  %v95_v26 = vld [vmem:[%s1366_s1 + $0x1c8] sm:$0xff]  ;;  %v46_v32 = vld [vmem:[%s1366_s1 + $0x40] sm:$0xff]  ;;  %v61_v34 = vld [vmem:[%s1366_s1 + $0xb8] sm:$0xff] }
   0xb   :  { %768 = vmatpush3.msra.mxu1 %v82_v16  ;;  %735 = vmatpush3.msra.mxu0 %v49_v17  ;;  %v79_v28 = vld [vmem:[%s1366_s1 + $0x148] sm:$0xff]  ;;  %v94_v33 = vld [vmem:[%s1366_s1 + $0x1c0] sm:$0xff]  ;;  %v45_v36 = vld [vmem:[%s1366_s1 + $0x38] sm:$0xff] }
   0xc   :  { %769 = vmatprep.subr.mxu1 %v97_v18  ;;  %736 = vmatprep.subr.mxu0 %v64_v19  ;;  %v78_v35 = vld [vmem:[%s1366_s1 + $0x140] sm:$0xff]  ;;  %v93_v37 = vld [vmem:[%s1366_s1 + $0x1b8] sm:$0xff]  ;;  %v60_v38 = vld [vmem:[%s1366_s1 + $0xb0] sm:$0xff] }
   0xd   :  { %770 = vmatpush3.msra.mxu1 %v81_v20  ;;  %737 = vmatpush3.msra.mxu0 %v48_v21  ;;  %v77_v39 = vld [vmem:[%s1366_s1 + $0x138] sm:$0xff]  ;;  %v44_v42 = vld [vmem:[%s1366_s1 + $0x30] sm:$0xff]  ;;  %v59_v43 = vld [vmem:[%s1366_s1 + $0xa8] sm:$0xff] }
   0xe   :  { %771 = vmatprep.subr.mxu1 %v96_v22  ;;  %738 = vmatprep.subr.mxu0 %v63_v23  ;;  %v92_v44 = vld [vmem:[%s1366_s1 + $0x1b0] sm:$0xff]  ;;  %v43_v45 = vld [vmem:[%s1366_s1 + $0x28] sm:$0xff]  ;;  %v58_v47 = vld [vmem:[%s1366_s1 + $0xa0] sm:$0xff] }
   0xf   :  { %772 = vmatpush3.msra.mxu1 %v80_v24  ;;  %739 = vmatpush3.msra.mxu0 %v47_v25  ;;  %v76_v46 = vld [vmem:[%s1366_s1 + $0x130] sm:$0xff]  ;;  %v91_v48 = vld [vmem:[%s1366_s1 + $0x1a8] sm:$0xff]  ;;  %v42_v49 = vld [vmem:[%s1366_s1 + $0x20] sm:$0xff] }
  0x10   :  { %773 = vmatprep.subr.mxu1 %v95_v26  ;;  %740 = vmatprep.subr.mxu0 %v62_v27  ;;  %v75_v50 = vld [vmem:[%s1366_s1 + $0x128] sm:$0xff]  ;;  %v57_v51 = vld [vmem:[%s1366_s1 + $0x98] sm:$0xff]  ;;  %v90_v52 = vld [vmem:[%s1366_s1 + $0x1a0] sm:$0xff]  ;;  %v917_v27 = vmov 0.0  }
  0x11   :  { %774 = vmatpush3.msra.mxu1 %v79_v28  ;;  %741 = vmatpush3.msra.mxu0 %v46_v32  ;;  %v74_v54 = vld [vmem:[%s1366_s1 + $0x120] sm:$0xff]  ;;  %v884_v56 = vld [vmem:[%s1365_s0 + $0x1c] ss:$14 sps:$4 sm:$0xff]   ;;  %v56_v58 = vld [vmem:[%s1366_s1 + $0x90] sm:$0xff] }
  0x12   :  { %775 = vmatprep.subr.mxu1 %v94_v33  ;;  %742 = vmatprep.subr.mxu0 %v61_v34  ;;  %v882_v55 = vld [vmem:[%s1365_s0] ss:$14 sps:$4 sm:$0xff]   ;;  %v41_v57 = vld [vmem:[%s1366_s1 + $0x18] sm:$0xff]  ;;  %v176_v62 = vrot.slane %v884_v56, %v1111_v53  ;;  %v886_v63 = vld [vmem:[%s1365_s0 + $0x4] ss:$14 sps:$4 sm:$0xff]  }
  0x13   :  { %776 = vmatpush3.msra.mxu1 %v78_v35  ;;  %743 = vmatpush3.msra.mxu0 %v45_v36  ;;  %v89_v59 = vld [vmem:[%s1366_s1 + $0x198] sm:$0xff]  ;;  %v162_v61 = vrot.slane %v882_v55, %v1111_v53  ;;  %v887_v0 = vld [vmem:[%s1365_s0 + $0x20] ss:$14 sps:$4 sm:$0xff]   ;;  %v169_v8 = vrot.slane %v886_v63, %v1111_v53  ;;  %v891_v26 = vld [vmem:[%s1365_s0 + $0x24] ss:$14 sps:$4 sm:$0xff]  }
  0x14   :  { %777 = vmatprep.subr.mxu1 %v93_v37  ;;  %744 = vmatprep.subr.mxu0 %v60_v38  ;;  %v73_v60 = vld [vmem:[%s1366_s1 + $0x118] sm:$0xff]  ;;  %v40_v1 = vld [vmem:[%s1366_s1 + $0x10] sm:$0xff]  ;;  %v55_v3 = vld [vmem:[%s1366_s1 + $0x88] sm:$0xff]  ;;  %v183_v9 = vrot.slane %v887_v0, %v1111_v53  ;;  %v1218_v32 = vrot.slane %v891_v26, %v1111_v53 }
  0x15   :  { %778 = vmatpush3.msra.mxu1 %v77_v39  ;;  %745 = vmatpush3.msra.mxu0 %v44_v42  ;;  %v88_v2 = vld [vmem:[%s1366_s1 + $0x190] sm:$0xff]  ;;  %v39_v5 = vld [vmem:[%s1366_s1 + $0x8] sm:$0xff]  ;;  %v185_v7 = vcombine.high %v162_v61, %v176_v62  ;;  %v54_v10 = vld [vmem:[%s1366_s1 + $0x80] sm:$0xff]  ;;  %v184_v13 = vcombine.low %v162_v61, %v176_v62 }
  0x16   :  { %779 = vmatprep.subr.mxu1 %v92_v44  ;;  %746 = vmatprep.subr.mxu0 %v59_v43  ;;  %v72_v4 = vld [vmem:[%s1366_s1 + $0x110] sm:$0xff]  ;;  %v87_v6 = vld [vmem:[%s1366_s1 + $0x188] sm:$0xff]  ;;  %v38_v11 = vld [vmem:[%s1366_s1] sm:$0xff]  ;;  %v187_v17 = vcombine.high %v169_v8, %v183_v9  ;;  %v186_v19 = vcombine.low %v169_v8, %v183_v9 }
  0x17   :  { %780 = vmatpush3.msra.mxu1 %v76_v46  ;;  %747 = vmatpush3.msra.mxu0 %v43_v45  ;;  %v71_v12 = vld [vmem:[%s1366_s1 + $0x108] sm:$0xff]  ;;  %v86_v14 = vld [vmem:[%s1366_s1 + $0x180] sm:$0xff]  ;;  %v133_v15 = vld [vmem:[%s1366_s1 + $0x2f8] sm:$0xff] }
  0x18   :  { %781 = vmatprep.subr.mxu1 %v91_v48  ;;  %748 = vmatprep.subr.mxu0 %v58_v47  ;;  %v70_v16 = vld [vmem:[%s1366_s1 + $0x100] sm:$0xff]  ;;  %v117_v18 = vld [vmem:[%s1366_s1 + $0x278] sm:$0xff]  ;;  %v132_v20 = vld [vmem:[%s1366_s1 + $0x2f0] sm:$0xff] }
  0x19   :  { %782 = vmatpush3.msra.mxu1 %v75_v50  ;;  %749 = vmatpush3.msra.mxu0 %v42_v49  ;;  %v116_v21 = vld [vmem:[%s1366_s1 + $0x270] sm:$0xff]  ;;  %v131_v22 = vld [vmem:[%s1366_s1 + $0x2e8] sm:$0xff]  ;;  %v130_v24 = vld [vmem:[%s1366_s1 + $0x2e0] sm:$0xff] }
  0x1a   :  { %783 = vmatprep.subr.mxu1 %v90_v52  ;;  %750 = vmatprep.subr.mxu0 %v57_v51  ;;  %v115_v23 = vld [vmem:[%s1366_s1 + $0x268] sm:$0xff]  ;;  %v114_v30 = vld [vmem:[%s1366_s1 + $0x260] sm:$0xff]  ;;  %v136_v33 = vld [vmem:[%s1366_s1 + $0x310] sm:$0x1] }
  0x1b   :  { %784 = vmatpush3.msra.mxu1 %v74_v54  ;;  %751 = vmatpush3.msra.mxu0 %v41_v57  ;;  %v888_v25 = vld [vmem:[%s1365_s0 + $0x8] ss:$14 sps:$4 sm:$0xff]   ;;  %v890_v28 = vld [vmem:[%s1365_s0 + $0xc] ss:$14 sps:$4 sm:$0x33]   ;;  %v134_v41 = vld [vmem:[%s1366_s1 + $0x300] sm:$0xff] }
  0x1c   :  { %785 = vmatprep.subr.mxu1 %v89_v59  ;;  %752 = vmatprep.subr.mxu0 %v56_v58  ;;  %v893_v29 = vld [vmem:[%s1365_s0 + $0x28] ss:$14 sps:$4 sm:$0x33]   ;;  %v1215_v31 = vrot.slane %v888_v25, %v1111_v53  ;;  %v129_v35 = vld [vmem:[%s1366_s1 + $0x2d8] sm:$0xff]  ;;  %v205_v36 = vrot.slane %v890_v28, %v1111_v53  ;;  %v126_v46 = vld [vmem:[%s1366_s1 + $0x2c0] sm:$0xff] }
  0x1d   :  { %786 = vmatpush3.msra.mxu1 %v73_v60  ;;  %753 = vmatpush3.msra.mxu0 %v40_v1  ;;  %v135_v34 = vld [vmem:[%s1366_s1 + $0x308] sm:$0xff]  ;;  %v219_v37 = vrot.slane %v893_v29, %v1111_v53  ;;  %v113_v38 = vld [vmem:[%s1366_s1 + $0x258] sm:$0xff]  ;;  %v128_v40 = vld [vmem:[%s1366_s1 + $0x2d0] sm:$0xff] }
  0x1e   :  { %787 = vmatprep.subr.mxu1 %v88_v2  ;;  %754 = vmatprep.subr.mxu0 %v55_v3  ;;  %v221_v39 = vcombine.high %v1215_v31, %v1218_v32  ;;  %v112_v43 = vld [vmem:[%s1366_s1 + $0x250] sm:$0xff]  ;;  %v127_v44 = vld [vmem:[%s1366_s1 + $0x2c8] sm:$0xff]  ;;  %v110_v47 = vld [vmem:[%s1366_s1 + $0x240] sm:$0xff]  ;;  %v220_v0 = vcombine.low %v1215_v31, %v1218_v32 }
  0x1f   :  { %788 = vmatpush3.msra.mxu1 %v72_v4  ;;  %755 = vmatpush3.msra.mxu0 %v39_v5  ;;  %v222_v42 = vcombine.low %v205_v36, %v219_v37  ;;  %v111_v45 = vld [vmem:[%s1366_s1 + $0x248] sm:$0xff]  ;;  %v125_v48 = vld [vmem:[%s1366_s1 + $0x2b8] sm:$0xff]  ;;  %v124_v50 = vld [vmem:[%s1366_s1 + $0x2b0] sm:$0xff] }
  0x20   :  { %789 = vmatprep.subr.mxu1 %v87_v6  ;;  %756 = vmatprep.subr.mxu0 %v54_v10  ;;  %v109_v49 = vld [vmem:[%s1366_s1 + $0x238] sm:$0xff]  ;;  %v108_v51 = vld [vmem:[%s1366_s1 + $0x230] sm:$0xff]  ;;  %v123_v52 = vld [vmem:[%s1366_s1 + $0x2a8] sm:$0xff] }
  0x21   :  { %300 = vmatprep.mubr.f32.mxu0 %v185_v7  ;;  %757 = vmatpush3.msra.mxu0 %v38_v11  ;;  %v107_v53 = vld [vmem:[%s1366_s1 + $0x228] sm:$0xff]  ;;  %v122_v54 = vld [vmem:[%s1366_s1 + $0x2a0] sm:$0xff]  ;;  %v121_v56 = vld [vmem:[%s1366_s1 + $0x298] sm:$0xff] }
  0x22   :  { %790 = vmatpush3.msra.mxu1 %v71_v12  ;;  %301 = vmatmul.mubr.f32.vlgmr.msra.gmra.mxu0 %v184_v13  ;;  %v106_v55 = vld [vmem:[%s1366_s1 + $0x220] sm:$0xff]  ;;  %v105_v57 = vld [vmem:[%s1366_s1 + $0x218] sm:$0xff]  ;;  %v120_v58 = vld [vmem:[%s1366_s1 + $0x290] sm:$0xff] }
  0x23   :  { %791 = vmatprep.subr.mxu1 %v86_v14  ;;  %796 = vmatprep.subr.mxu0 %v133_v15  ;;  %v104_v59 = vld [vmem:[%s1366_s1 + $0x210] sm:$0xff]  ;;  %v119_v60 = vld [vmem:[%s1366_s1 + $0x288] sm:$0xff]  ;;  %v118_v62 = vld [vmem:[%s1366_s1 + $0x280] sm:$0xff] }
  0x24   :  { %792 = vmatpush3.msra.mxu1 %v70_v16  ;;  %370 = vmatprep.mubr.f32.mxu1 %v187_v17  ;;  %v103_v61 = vld [vmem:[%s1366_s1 + $0x208] sm:$0xff]  ;;  %v102_v63 = vld [vmem:[%s1366_s1 + $0x200] sm:$0xff]  ;;  %v522_v1 = vld [vmem:[%s1368_s3 + $0x18] sm:$0xff] }
  0x25   :  { %797 = vmatpush3.msra.mxu0 %v117_v18  ;;  %371 = vmatmul.mubr.f32.vlgmr.msra.gmra.mxu1 %v186_v19  ;;  %v521_v2 = vld [vmem:[%s1368_s3 + $0x10] sm:$0xff]  ;;  %v520_v3 = vld [vmem:[%s1368_s3 + $0x8] sm:$0xff]  ;;  %v519_v4 = vld [vmem:[%s1368_s3] sm:$0xff] }
  0x26   :  { %798 = vmatprep.subr.mxu0 %v132_v20  ;;  %845 = vmatprep.subr.mxu1 %v917_v27  ;;  %v718_v12 = vld [vmem:[%s1367_s2] ss:$0 sm:$0xff]  ;;  %v617_v25 = vld [vmem:[%s1371_s6 + $0x8] sm:$0xff] }
  0x27   :  { %799 = vmatpush3.msra.mxu0 %v116_v21  ;;  %851 = vmatprep.mubr.msk.f32.mxu1 %vm918_vm1, %v917_v27  ;;  %v616_v26 = vld [vmem:[%s1371_s6] sm:$0xff] }
  0x28   :  { %800 = vmatprep.subr.mxu0 %v131_v22  ;;  %846 = vmatpush3.msk.msra.mxu1 %vm232_vm0, %v136_v33  ;;  %v722_v28 = vld [vmem:[%s1369_s4] ss:$0 sm:$0xff] }
  0x29   :  { %801 = vmatpush3.msra.mxu0 %v115_v23  ;;  %847 = vmatprep.subr.mxu1 %v917_v27  ;;  %v619_v23 = vld [vmem:[%s1371_s6 + $0x18] sm:$0xff] }
  0x2a   :  { %802 = vmatprep.subr.mxu0 %v130_v24  ;;  %848 = vmatpush3.msra.mxu1 %v135_v34  ;;  %v618_v24 = vld [vmem:[%s1371_s6 + $0x10] sm:$0xff] }
  0x2b   :  { %803 = vmatpush3.msra.mxu0 %v114_v30  ;;  %440 = vmatprep.mubr.f32.mxu0 %v221_v39  ;;  %v723_v30 = vld [vmem:[%s1370_s5] ss:$0 sm:$0xff] }
  0x2c   :  { %804 = vmatprep.subr.mxu0 %v129_v35  ;;  %849 = vmatprep.subr.mxu1 %v917_v27 }
  0x2d   :  { %805 = vmatpush3.msra.mxu0 %v113_v38  ;;  %850 = vmatpush3.msra.mxu1 %v134_v41 }
  0x2e   :  { %806 = vmatprep.subr.mxu0 %v128_v40  ;;  %852 = vmatmul.mubr.msk.f32.vlgmr.msra.gmra.mxu1 %vm229_vm2, %v222_v42 }
  0x2f   :  { %807 = vmatpush3.msra.mxu0 %v112_v43  ;;  %854 = vmatprep.subr.mxu1 %v917_v27 }
  0x30   :  { %808 = vmatprep.subr.mxu0 %v127_v44  ;;  %862 = vmatprep.mubr.msk.f32.mxu1 %vm918_vm1, %v917_v27 }
  0x31   :  { %809 = vmatpush3.msra.mxu0 %v111_v45  ;;  %855 = vmatpush3.msra.mxu1 %v522_v1 }
  0x32   :  { %810 = vmatprep.subr.mxu0 %v126_v46  ;;  %856 = vmatprep.subr.mxu1 %v917_v27 }
  0x33   :  { %811 = vmatpush3.msra.mxu0 %v110_v47  ;;  %857 = vmatpush3.msra.mxu1 %v521_v2 }
  0x34   :  { %812 = vmatprep.subr.mxu0 %v125_v48  ;;  %858 = vmatprep.subr.mxu1 %v917_v27 }
  0x35   :  { %813 = vmatpush3.msra.mxu0 %v109_v49  ;;  %859 = vmatpush3.msra.mxu1 %v520_v3 }
  0x36   :  { %814 = vmatprep.subr.mxu0 %v124_v50  ;;  %860 = vmatprep.subr.mxu1 %v917_v27 }
  0x37   :  { %815 = vmatpush3.msra.mxu0 %v108_v51  ;;  %861 = vmatpush3.msra.mxu1 %v519_v4 }
  0x38   :  { %816 = vmatprep.subr.mxu0 %v123_v52  ;;  %865 = vmatprep.subr.mxu1 %v917_v27 }
  0x39   :  { %817 = vmatpush3.msra.mxu0 %v107_v53 }
  0x3a   :  { %818 = vmatprep.subr.mxu0 %v122_v54 }
  0x3b   :  { %819 = vmatpush3.msra.mxu0 %v106_v55 }
  0x3c   :  { %820 = vmatprep.subr.mxu0 %v121_v56 }
  0x3d   :  { %821 = vmatpush3.msra.mxu0 %v105_v57 }
  0x3e   :  { %822 = vmatprep.subr.mxu0 %v120_v58 }
  0x3f   :  { %823 = vmatpush3.msra.mxu0 %v104_v59 }
  0x40   :  { %824 = vmatprep.subr.mxu0 %v119_v60 }
  0x41   :  { %825 = vmatpush3.msra.mxu0 %v103_v61 }
  0x42   :  { %826 = vmatprep.subr.mxu0 %v118_v62 }
  0x43   :  { %827 = vmatpush3.msra.mxu0 %v102_v63 }
  0x44   :  { %441 = vmatmul.mubr.f32.vlgmr.msra.gmra.mxu0 %v220_v0 }
  0xe2   :  { %v758_v9 = vpop.f32.mrf.mxu0 }
  0xe4   :  { %v759_v10 = vpop.f32.mrf.mxu0 }
  0xe5   :  { %v793_v5 = vpop.f32.mrf.mxu1  ;;  %v760_v11 = vadd.f32 %v759_v10, %v758_v9 }
  0xe7   :  { %v794_v6 = vpop.f32.mrf.mxu1  ;;  %v303_v13 = vadd.f32 %v760_v11, %v718_v12 }
  0xe8   :  { %v795_v14 = vadd.f32 %v794_v6, %v793_v5 }
  0xea   :  { %v373_v17 = vadd.f32 %v795_v14, %v303_v13 }
  0xee   :  { %v512_v7 = vpop.f32.mrf.mxu1 }
  0xf0   :  { %v853_v8 = vpop.f32.mrf.mxu1 }
 0x104   :  { %v828_v15 = vpop.f32.mrf.mxu0 }
 0x106   :  { %v829_v16 = vpop.f32.mrf.mxu0 }
 0x107   :  { %v830_v18 = vadd.f32 %v829_v16, %v828_v15 }
 0x109   :  { %v443_v19 = vadd.f32 %v830_v18, %v373_v17 }
 0x10b   :  { %v513_v20 = vadd.f32 %v512_v7, %v443_v19 }
 0x10d   :  { %vm516_vm3 = vcmp.gt.f32.partialorder %v513_v20, 0.0  ;;  %v517_v21 = vmul.f32 0.2, %v513_v20 }
 0x10f   :  { %v518_v22 = vsel %vm516_vm3, %v513_v20, %v517_v21 }
 0x110   :  { %863 = vmatmul.mubr.msk.f32.vlgmr.msra.gmra.mxu1 %vm523_vm4, %v518_v22 }
 0x111   :  { %873 = vmatprep.mubr.msk.f32.mxu1 %vm918_vm1, %v917_v27  ;;  %866 = vmatpush3.msra.mxu1 %v619_v23 }
 0x112   :  { %867 = vmatprep.subr.mxu1 %v917_v27 }
 0x113   :  { %868 = vmatpush3.msra.mxu1 %v618_v24 }
 0x114   :  { %869 = vmatprep.subr.mxu1 %v917_v27 }
 0x115   :  { %870 = vmatpush3.msra.mxu1 %v617_v25 }
 0x116   :  { %871 = vmatprep.subr.mxu1 %v917_v27  ;;  %v724_v27 = vld [vmem:[%s1372_s7] ss:$0 sm:$0xff] }
 0x117   :  { %872 = vmatpush3.msra.mxu1 %v616_v26 }
 0x1d0   :  { %v593_v29 = vpop.f32.mrf.mxu1 }
 0x1d1   :  { %v604_v31 = vmul.f32 %v722_v28, %v593_v29 }
 0x1d2   :  { %v864_v32 = vpop.f32.mrf.mxu1 }
 0x1d3   :  { %v612_v33 = vadd.f32 %v723_v30, %v604_v31 }
 0x1d5   :  { %vm613_vm5 = vcmp.gt.f32.partialorder %v612_v33, 0.0  ;;  %v614_v34 = vmul.f32 0.2, %v612_v33 }
 0x1d7   :  { %v615_v35 = vsel %vm613_vm5, %v612_v33, %v614_v34 }
 0x1d8   :  { %874 = vmatmul.mubr.msk.f32.vlgmr.msra.gmra.mxu1 %vm523_vm4, %v615_v35 }
 0x298   :  { %v696_v36 = vpop.f32.mrf.mxu1 }
 0x299   :  { %v697_v37 = vadd.f32 %v724_v27, %v696_v36 }
 0x29a   :  { %v875_v38 = vpop.f32.mrf.mxu1 }
 0x29b   :  { %701 = vst.msk [vmem:[#allocation2] sm:$0xff] %vm700_vm6, %v697_v37 }
 0x29c   :  { %706 = vsyncadd [#allocation3], 96  ;;  %s919_s4 = smov [#allocation2]  }
 0x29d   :  { %s707_s5 = sshll.u32 %s919_s4, 4  ;;  %s708_s5 = int_to_ptr.vmem [resolvable:$true] %s707_s5 }
 0x29e   :  { %s894_s15 = scalar_lea.vmem %s708_s5, 32  ;;  %s898_s16 = scalar_lea.vmem %s708_s5, 128 }
 0x29f   :  { %p895_p0 = scmp.ne.s32.totalorder %s708_s5, %s894_s15  ;;  %p899_p1 = scmp.lt.s32.totalorder %s708_s5, %s708_s5 }
 0x2a0   :  { %p900_p2 = scmp.lt.s32.totalorder %s898_s16, %s894_s15 }
 0x2a2   :  { %p901_p3 = por %p900_p2, %p899_p1 }
 0x2a4   :  { %p902_p4 = pnand %p901_p3, %p895_p0 }
 0x2a6   :  { %905 = shalt.err (!%p902_p4)
}
 0x2a7   :  { %s920_s17 = smov 32   ;;  %s921_s18 = smov 2  }
 0x2a8   :  { %713 = dma.vmem_to_hbm [thread:$0]  %s708_s5, 32, %s1373_s8, [#allocation3], %s920_s17, %s920_s17, %s921_s18  }
 0x2a9   :  { %914 = dma.done.wait [#allocation3], 128  }
 0x2aa   :  { %915 = vsyncadd [#allocation3], 4294967168 }
 0x2ab   :  { %717 = vsyncpa [#allocation3], 1 }

</bundles_post_ra>
